<compile_context>
chip_gen: v5e
topology: v5e:2x2
jax: 0.10.0
libtpu: 0.0.40
codegen_flags: <defaults>
</compile_context>

<pallas_src>
import functools

import jax
import jax.numpy as jnp
from jax import lax
from jax.experimental import pallas as pl
from jax.experimental.pallas import tpu as pltpu

_VMEM_BLOCK_BUDGET = 6 << 20   # target raw bytes of x+out blocks per grid step
_VMEM_LIMIT = 48 << 20         # requested scoped VMEM (< 64 MiB physical on v7x)


def _divisors(n: int):
    return [d for d in range(1, n + 1) if n % d == 0]


def _interp_matrix(n_in: int, scale: int, mode: str, dtype) -> jnp.ndarray:
    """1-D interpolation matrix M of shape (n_in*scale, n_in): out = M @ x."""
    n_out = n_in * scale
    i = jnp.arange(n_out, dtype=jnp.float32)
    cols = jnp.arange(n_in, dtype=jnp.float32)
    if mode == "nearest":
        # PyTorch nearest: src = floor(i * n_in / n_out) = floor(i / scale).
        src = jnp.floor(i / scale)
        m = (cols[None, :] == src[:, None]).astype(jnp.float32)
    elif mode == "bilinear":
        # PyTorch align_corners=False source coordinate, clamped at 0.
        src = jnp.maximum((i + 0.5) / scale - 0.5, 0.0)
        i0 = jnp.clip(jnp.floor(src), 0.0, float(n_in - 1))
        i1 = jnp.minimum(i0 + 1.0, float(n_in - 1))
        w1 = src - i0
        w0 = 1.0 - w1
        m = (w0[:, None] * (cols[None, :] == i0[:, None]).astype(jnp.float32)
             + w1[:, None] * (cols[None, :] == i1[:, None]).astype(jnp.float32))
    else:
        # TODO(synk): other F.interpolate modes (bicubic, area, ...) not implemented.
        raise ValueError(f"unsupported mode: {mode}")
    return m.astype(dtype)


def _nearest_kernel(x_ref, e_ref, o_ref, *, scale):
    # x_ref: (Bc, TH, W)  e_ref: (W, W*S) one-hot  o_ref: (Bc, TH, S*W*S)
    bc, th, w = x_ref.shape
    ws = e_ref.shape[1]
    # W-direction replication as one exact one-hot matmul; planes folded into
    # the M dim so the single MXU op is large (MXU is idle in this mem-bound
    # kernel). HIGHEST precision keeps the 0/1 selection at f32 accuracy.
    xe = jnp.dot(x_ref[...].reshape(bc * th, w), e_ref[...],
                 preferred_element_type=jnp.float32,
                 precision=lax.Precision.HIGHEST)
    xe = xe.astype(o_ref.dtype).reshape(bc, th, ws)
    # H-direction replication: the S identical output rows of a group sit next
    # to each other along lanes in the (NC, H, S*W*S) output view -> pure lane
    # concat. No R matrix, no second matmul.
    o_ref[...] = jnp.concatenate([xe] * scale, axis=-1)


def _bilinear_kernel(x_ref, rs_ref, e_ref, o_ref, *, scale):
    # x_ref: (Bc, H, W)  rs_ref: (S, H, H)  e_ref: (W, W*S)  o_ref: (Bc, H, S*W*S)
    bc, h, w = x_ref.shape
    ws = e_ref.shape[1]
    xarr = x_ref[...]
    # W-direction: fold the plane batch into rows -> one large 2-D MXU matmul.
    xe = jnp.dot(xarr.reshape(bc * h, w), e_ref[...],
                 preferred_element_type=jnp.float32)
    xe = xe.astype(xarr.dtype).reshape(bc, h, ws)
    # H-direction: one batched matmul per intra-group output-row offset k; the
    # S results concatenated along lanes form the (H, S*W*S) row-major view.
    parts = []
    for k in range(scale):
        r_k = jnp.broadcast_to(rs_ref[k], (bc, h, h))
        y_k = jnp.einsum("boh,bhw->bow", r_k, xe,
                         preferred_element_type=jnp.float32)
        parts.append(y_k.astype(o_ref.dtype))
    o_ref[...] = jnp.concatenate(parts, axis=-1)


def upsample(x: jnp.ndarray, scale_factor: int = 2, mode: str = "nearest") -> jnp.ndarray:
    """Equivalent of Upsample(scale_factor, mode).forward(x) for NCHW float input."""
    if x.ndim != 4:
        raise ValueError("expected NCHW input")
    if not jnp.issubdtype(x.dtype, jnp.floating):
        # PyTorch also rejects bilinear on integer tensors; keep kernel float-only.
        raise ValueError("upsample kernel supports floating dtypes only")
    s = int(scale_factor)
    if s != scale_factor or s < 1:
        raise ValueError("scale_factor must be a positive integer")

    n, c, h, w = x.shape
    nc = n * c
    itemsize = jnp.dtype(x.dtype).itemsize
    out_last = s * w * s                      # lane-dense output view (NC, H, S*W*S)
    xb = x.reshape(nc, h, w)
    e = jnp.transpose(_interp_matrix(w, s, mode, x.dtype))      # (W, W*S)

    if mode == "nearest":
        # ---- choose an H tile: full H unless a big plane would blow VMEM ----
        row_bytes = (w + out_last) * itemsize
        th = h
        if h * row_bytes > _VMEM_BLOCK_BUDGET:
            for align in (16, 8):
                cand = [d for d in _divisors(h)
                        if d % align == 0 and d * row_bytes <= _VMEM_BLOCK_BUDGET]
                if cand:
                    th = max(cand)
                    break
        # ---- batch planes per grid step within the VMEM budget ----
        plane_bytes = th * row_bytes
        cand = [d for d in _divisors(nc) if d * plane_bytes <= _VMEM_BLOCK_BUDGET]
        bc = max(cand) if cand else 1
        if bc == nc and nc > 1 and h // th == 1:
            bc = max(d for d in _divisors(nc) if d < nc)  # keep >=2 steps (megacore)
        grid = (nc // bc, h // th)
        out = pl.pallas_call(
            functools.partial(_nearest_kernel, scale=s),
            out_shape=jax.ShapeDtypeStruct((nc, h, out_last), x.dtype),
            grid=grid,
            in_specs=[
                pl.BlockSpec((bc, th, w), lambda b, r: (b, r, 0)),
                pl.BlockSpec((w, w * s), lambda b, r: (0, 0)),
            ],
            out_specs=pl.BlockSpec((bc, th, out_last), lambda b, r: (b, r, 0)),
            compiler_params=pltpu.CompilerParams(
                dimension_semantics=("parallel", "parallel"),
                vmem_limit_bytes=_VMEM_LIMIT,
            ),
        )(xb, e)
    elif mode == "bilinear":
        r = _interp_matrix(h, s, mode, x.dtype)                  # (H*S, H)
        rs = r.reshape(h, s, h).transpose(1, 0, 2)               # (S, H, H): rs[k][i] = R[i*S+k]
        # Whole plane per step; batch planes within the VMEM budget.
        plane_bytes = (h * w + h * out_last) * itemsize + (h * w * s + h * h) * 4
        cand = [d for d in _divisors(nc) if d * plane_bytes <= _VMEM_BLOCK_BUDGET]
        bc = max(cand) if cand else 1
        if bc == nc and nc > 1:
            bc = max(d for d in _divisors(nc) if d < nc)         # keep >=2 steps
        # TODO(synk): very large planes (plane_bytes > budget even at bc=1) would need
        # H-tiling with a halo or a 2-tap VPU blend instead of the dense R/E matmuls.
        grid = (nc // bc,)
        out = pl.pallas_call(
            functools.partial(_bilinear_kernel, scale=s),
            out_shape=jax.ShapeDtypeStruct((nc, h, out_last), x.dtype),
            grid=grid,
            in_specs=[
                pl.BlockSpec((bc, h, w), lambda b: (b, 0, 0)),
                pl.BlockSpec((s, h, h), lambda b: (0, 0, 0)),
                pl.BlockSpec((w, w * s), lambda b: (0, 0)),
            ],
            out_specs=pl.BlockSpec((bc, h, out_last), lambda b: (b, 0, 0)),
            compiler_params=pltpu.CompilerParams(
                dimension_semantics=("parallel",),
                vmem_limit_bytes=_VMEM_LIMIT,
            ),
        )(xb, rs, e)
    else:
        raise ValueError(f"unsupported mode: {mode}")

    # (NC, H, S*W*S) is the row-major layout of (NC, H*S, W*S); reshape is free.
    return out.reshape(n, c, h * s, w * s)


if __name__ == "__main__":
    key = jax.random.PRNGKey(0)
    x = jax.random.normal(key, (2, 4, 16, 16), dtype=jnp.float32)

    # Default module config: scale_factor=2, mode="nearest".
    y = upsample(x, scale_factor=2, mode="nearest")
    jax.block_until_ready(y)
    assert y.shape == (2, 4, 32, 32), y.shape
    ref_n = jnp.repeat(jnp.repeat(x, 2, axis=2), 2, axis=3)
    assert jnp.allclose(y, ref_n, atol=1e-5, rtol=1e-5), "nearest upsample mismatch"

    # Bilinear path (PyTorch align_corners=False semantics).
    yb = upsample(x, scale_factor=2, mode="bilinear")
    jax.block_until_ready(yb)
    assert yb.shape == (2, 4, 32, 32), yb.shape
    m_ref = _interp_matrix(16, 2, "bilinear", jnp.float32)       # (32, 16)
    ref_b = jnp.einsum("oh,nchw,pw->ncop", m_ref, x, m_ref)
    assert jnp.allclose(yb, ref_b, atol=1e-4, rtol=1e-4), "bilinear upsample mismatch"

    print("KERNEL_OK")
</pallas_src>

<mosaic_0001>
module attributes {stable_mosaic.version = 11 : i64} {
  func.func @_nearest_kernel(%arg0: i32, %arg1: i32, %arg2: memref<4x16x16xf32, #tpu.memory_space<vmem>>, %arg3: memref<16x32xf32, #tpu.memory_space<vmem>>, %arg4: memref<4x16x64xf32, #tpu.memory_space<vmem>>) attributes {dimension_semantics = [#tpu.dimension_semantics<parallel>, #tpu.dimension_semantics<parallel>], iteration_bounds = array<i64: 2, 1>, scalar_prefetch = 0 : i64, scratch_operands = 0 : i64, tpu.core_type = #tpu.core_type<tc>, window_params = [{transform_indices = @transform_0, window_bounds = array<i64: 4, 16, 16>}, {pipeline_mode = #tpu.pipeline_mode<synchronous>, transform_indices = @transform_1, window_bounds = array<i64: 16, 32>}, {transform_indices = @transform_2, window_bounds = array<i64: 4, 16, 64>}]} {
    %c0 = arith.constant 0 : index
    %c0_0 = arith.constant 0 : index
    %c0_1 = arith.constant 0 : index
    %0 = vector.load %arg2[%c0, %c0_0, %c0_1] : memref<4x16x16xf32, #tpu.memory_space<vmem>>, vector<4x16x16xf32>
    %1 = vector.shape_cast %0 : vector<4x16x16xf32> to vector<64x16xf32>
    %c0_2 = arith.constant 0 : index
    %c0_3 = arith.constant 0 : index
    %2 = vector.load %arg3[%c0_2, %c0_3] : memref<16x32xf32, #tpu.memory_space<vmem>>, vector<16x32xf32>
    %cst = arith.constant dense<0.000000e+00> : vector<64x32xf32>
    %3 = tpu.matmul %1, %2, %cst {dimension_numbers = #tpu.dot_dimension_numbers<[1], [0], [0], [1], [0, 0, 1, 1], [], []>, precision = #tpu.contract_precision<fp32>} : vector<64x16xf32>, vector<16x32xf32>, vector<64x32xf32> -> vector<64x32xf32>
    %4 = vector.shape_cast %3 : vector<64x32xf32> to vector<4x16x32xf32>
    %5 = tpu.concatenate %4, %4 in 2 : vector<4x16x32xf32>, vector<4x16x32xf32> -> vector<4x16x64xf32>
    %c0_4 = arith.constant 0 : index
    %c0_5 = arith.constant 0 : index
    %c0_6 = arith.constant 0 : index
    %6 = vector.load %arg4[%c0_4, %c0_5, %c0_6] : memref<4x16x64xf32, #tpu.memory_space<vmem>>, vector<4x16x64xf32>
    tpu.vector_store %arg4[%c0_4, %c0_5, %c0_6], %5 {strides = array<i32>} : memref<4x16x64xf32, #tpu.memory_space<vmem>>, vector<4x16x64xf32>,
    return
  }
  func.func @transform_0(%arg0: i32, %arg1: i32) -> (i32, i32, i32) {
    %c0_i32 = arith.constant 0 : i32
    %c0_i32_0 = arith.constant 0 : i32
    return %arg0, %arg1, %c0_i32 : i32, i32, i32
  }
  func.func @transform_1(%arg0: i32, %arg1: i32) -> (i32, i32) {
    %c0_i32 = arith.constant 0 : i32
    %c0_i32_0 = arith.constant 0 : i32
    %c0_i32_1 = arith.constant 0 : i32
    return %c0_i32, %c0_i32_0 : i32, i32
  }
  func.func @transform_2(%arg0: i32, %arg1: i32) -> (i32, i32, i32) {
    %c0_i32 = arith.constant 0 : i32
    %c0_i32_0 = arith.constant 0 : i32
    return %arg0, %arg1, %c0_i32 : i32, i32, i32
  }
}

</mosaic_0001>

<bundles_post_ra>
// kernel: tpu_custom_call.1
= control target key start
LH: loop header
LB: loop body
LE: loop exit
PB: predicated region body
PF: predicated region fallthrough
CT: control target
= control target key end

     0   :  { %7 = vsyncpa [#allocation3], 0  ;;  %s1361_s0 = inlined_call_operand.hbm [shape: f32[8,16,16], index: 0, kind: input, shape index: {}]   ;;  %s1362_s1 = inlined_call_operand.hbm [shape: f32[16,32], index: 1, kind: input, shape index: {}]   ;;  %s1363_s2 = inlined_call_operand.hbm [shape: f32[8,16,64], index: 2, kind: output, shape index: {}]  }
   0x1   :  { %9 = vsyncpa [#allocation3 + $0x1], 0 }
   0x2   :  { %10 = vsyncpa [#allocation6], 0 }
   0x3   :  { %11 = vsyncpa [#allocation4], 0 }
   0x4   :  { %13 = vsyncpa [#allocation4 + $0x1], 0  ;;  %s1055_s9 = smov 0   ;;  %s1057_s10 = smov 0  }
   0x5   :  { %s1059_s11 = smov 0   ;;  %s1061_s12 = smov 0  }
   0x6   :  { %s1063_s13 = smov 0   ;;  %s1065_s14 = smov 0  }
   0x7 LB: > { %s781_s15 = sadd.s32 4294967295, %s1032_s14   ;;  %s782_s16 = sadd.s32 4294967294, %s1032_s14   ;;  %s1032_s14 = sphi %s1065_s14, %s19_s14   ;;  %s1028_s13 = sphi %s1063_s13, %s1375_s13   ;;  %s1024_s12 = sphi %s1061_s12, %s1374_s12   ;;  %s1020_s11 = sphi %s1059_s11, %s1373_s11   ;;  %s1016_s10 = sphi %s1057_s10, %s1372_s10   ;;  %s1012_s9 = sphi %s1055_s9, %s1371_s9  }
   0x8   : > { %p53_p0 = scmp.ne.s32.totalorder %s1016_s10, %s1012_s9  ;;  %p1089_p1 = scmp.eq.s32.totalorder %s781_s15, 0 }
   0x9   : > { %p1093_p2 = scmp.eq.s32.totalorder %s781_s15, 1  ;;  %p106_p3 = scmp.eq.s32.totalorder %s782_s16, 1 }
   0xa   : > { %p1099_p4 = por %p1089_p1, %p53_p0  ;;  %p783_p5 = scmp.ge.s32.totalorder %s1032_s14, 1 }
   0xb   : > { %p1104_p6 = por %p106_p3, %p53_p0  ;;  %p113_p7 = scmp.lt.s32.totalorder %s1032_s14, 3 }
   0xc   : > { %s124_s23 = sshll.u32 %s1362_s1, 4  ;;  %s1034_s25 = smov [#allocation5]   ;;  %s125_s23 = int_to_ptr.hbm [resolvable:$true] %s124_s23 }
   0xd   : > { %p1112_p8 = pnand %p783_p5, %p113_p7  ;;  %s126_s26 = sshll.u32 %s1034_s25, 4  ;;  %s127_s26 = int_to_ptr.vmem [resolvable:$true] %s126_s26 }
   0xe   : > { %p785_p11 = scmp.ge.s32.totalorder %s1032_s14, 2  ;;  %s1035_s27 = smov 128  }
   0xf   : > { %p816_p9 = pneg %p1112_p8  ;;  %s1036_s28 = smov 8  }
  0x10   : > { %s31_s29 = sadd.s32 1, %s1028_s13  ;;  %s40_s30 = sadd.s32 1, %s1020_s11 }
  0x11   : > { %p817_p10 = pnand %p816_p9, %p1089_p1  ;;  %p33_p12 = scmp.ge.s32.totalorder %s31_s29, 2 }
  0x12   : > { %p47_p13 = scmp.ne.s32.totalorder %s1020_s11, %s1016_s10  ;;  %p48_p0 = scmp.eq.s32.totalorder %s1032_s14, 0 }
  0x13   : > { %819 = dma.hbm_to_vmem [thread:$0]  (!%p817_p10), %s125_s23, 256, %s127_s26, [#allocation6], %s1035_s27, %s1035_s27, %s1036_s28  }
  0x14   : > { %s1377_s29 = smov (%p33_p12, %s31_s29), 0  ;;  %p1131_p3 = por %p48_p0, %p47_p13 }
  0x15   : > { %p1137_p5 = por %p1093_p2, %p47_p13  ;;  %s35_s5 = ssub.s32 %s1028_s13, %s1377_s29 }
  0x16   : > { %p829_p7 = scmp.lt.s32.totalorder %s1032_s14, 2  ;;  %p38_p9 = scmp.eq.s32.totalorder %s35_s5, 0 }
  0x17   : > { %s140_s6 = sand.u32 1, %s1020_s11   ;;  %s801_s15 = sshll.u32 %s1028_s13, 6 }
  0x18   : > { %s786_s7 = sshll.u32 %s140_s6, 6  ;;  %s152_s22 = scalar_lea.hbm %s1361_s0, %s801_s15 }
  0x19   : > { %s1146_s8 = scalar_select %p38_p9, %s1020_s11, %s40_s30  }
  0x1a   : > { %s144_s23 = scalar_lea.vmem [#allocation2], %s786_s7  ;;  %s153_s18 = sshll.u32 %s152_s22, 4  ;;  %s154_s18 = int_to_ptr.hbm [resolvable:$true] %s153_s18 }
  0x1b   : > { %s155_s25 = sshll.u32 %s144_s23, 4  ;;  %p821_p2 = pnand %p829_p7, %p1131_p3  ;;  %s156_s25 = int_to_ptr.vmem [resolvable:$true] %s155_s25 }
  0x1c   : > { %s141_s26 = scalar_lea.sflag [#allocation3], %s140_s6  ;;  %167 = sbr.rel (%p1112_p8) target bundleno = 397 (0x18d), region = 28 }
  0x1d   : > { %823 = dma.hbm_to_vmem [thread:$0]  (!%p821_p2), %s154_s18, 1024, %s156_s25, %s141_s26, %s1035_s27, %s1035_s27, %s1036_s28  }
  0x1e   : > { %s1160_s30 = sand.u32 (!%p1112_p8), 1, %s1016_s10  }
  0x1f   : > { %s791_s5 = sshll.u32 (!%p1112_p8), %s1160_s30, 6  ;;  %s170_s7 = scalar_lea.sflag (!%p1112_p8), [#allocation3], %s1160_s30 }
  0x20   : > { %s1166_s3 = scalar_lea.vmem (!%p1112_p8), [#allocation2], %s791_s5 }
  0x21   : > { %999 = dma.done.wait (%p1099_p4), %s170_s7, 1024  }
  0x22   : > { %1001 = vsyncadd (%p1099_p4), %s170_s7, 4294966272 }
  0x23   : > { %1003 = dma.done.wait (%p1089_p1), [#allocation6], 256  }
  0x24   : > { %1005 = vsyncadd (%p1089_p1), [#allocation6], 4294967040  ;;  %vm214_vm0 = vcmask 130048   ;;  %v213_v0 = vld [vmem:[#allocation5 + $0x8] sm:$0xff]  ;;  %v212_v1 = vld [vmem:[#allocation5] sm:$0xff]  ;;  %s1037_s17 = smov 32  }
  0x25   : > { %v208_v2 = vld [vmem:[%s1166_s3 + $0x20] sm:$0xff]  ;;  %v1177_v3 = vand.u32 4294901760, %v213_v0  ;;  %v1179_v4 = vand.u32 4294901760, %v212_v1  ;;  %v209_v6 = vld [vmem:[%s1166_s3 + $0x28] sm:$0xff]  ;;  %v210_v8 = vld [vmem:[%s1166_s3 + $0x30] sm:$0xff]  ;;  %vm647_vm1 = vcmask 261120  }
  0x26   : > { %v228_v5 = vsel %vm214_vm0, %v208_v2, 0  ;;  %v204_v7 = vld [vmem:[%s1166_s3] sm:$0xff]  ;;  %v231_v10 = vsel %vm214_vm0, %v209_v6, 0  ;;  %v205_v12 = vld [vmem:[%s1166_s3 + $0x8] sm:$0xff]  ;;  %v234_v18 = vsel %vm214_vm0, %v210_v8, 0  ;;  %v206_v33 = vld [vmem:[%s1166_s3 + $0x10] sm:$0xff] }
  0x27   : > { %v1185_v9 = vand.u32 4294901760, %v228_v5  ;;  %v216_v11 = vsel %vm214_vm0, %v204_v7, 0  ;;  %804 = vmatpush.msra.mxu2 %v1177_v3  ;;  %v337_v13 = vsub.f32 %v213_v0, %v1177_v3  ;;  %v343_v14 = vsub.f32 %v212_v1, %v1179_v4  ;;  %254 = vmatpush.msra.mxu0 %v1177_v3  ;;  %v211_v39 = vld [vmem:[%s1166_s3 + $0x38] sm:$0xff]  ;;  %s199_s19 = scalar_lea.vmem [#allocation7], %s791_s5  ;;  %s803_s24 = sshll.u32 %s1024_s12, 6 }
  0x28   : > { %v1194_v15 = vand.u32 4294901760, %v231_v10  ;;  %v1196_v16 = vand.u32 4294901760, %v216_v11  ;;  %v219_v19 = vsel %vm214_vm0, %v205_v12, 0  ;;  %v1219_v31 = vand.u32 4294901760, %v234_v18  ;;  %v207_v45 = vld [vmem:[%s1166_s3 + $0x18] sm:$0xff]  ;;  %s680_s6 = scalar_lea.hbm %s1363_s2, %s803_s24  ;;  %s681_s15 = sshll.u32 %s199_s19, 4  ;;  %s682_s15 = int_to_ptr.vmem [resolvable:$true] %s681_s15 }
  0x29   : > { %v1199_v17 = vsub.f32 %v228_v5, %v1185_v9  ;;  %805 = vmatpush.msra.mxu2 %v1179_v4  ;;  %v338_v20 = vand.u32 4294901760, %v337_v13  ;;  %v344_v21 = vand.u32 4294901760, %v343_v14  ;;  %256 = vmatpush.msra.mxu0 %v1179_v4  ;;  %v1212_v25 = vand.u32 4294901760, %v219_v19  ;;  %s683_s16 = sshll.u32 %s680_s6, 4  ;;  %s666_s12 = scalar_lea.sflag [#allocation4], %s1160_s30  ;;  %s684_s16 = int_to_ptr.hbm [resolvable:$true] %s683_s16 }
  0x2a   : > { %v1205_v22 = vsub.f32 %v231_v10, %v1194_v15  ;;  %v1209_v23 = vsub.f32 %v216_v11, %v1196_v16  ;;  %v222_v41 = vsel %vm214_vm0, %v206_v33, 0  ;;  %v1235_v43 = vsub.f32 %v234_v18, %v1219_v31  ;;  %s960_s21 = sshra.s32 %s684_s16, 4  ;;  %s966_s18 = scalar_lea.hbm %s1363_s2, 128  ;;  %s961_s21 = int_to_ptr.hbm [resolvable:$true] %s960_s21 }
  0x2b   : > { %v291_v24 = vand.u32 4294901760, %v1199_v17  ;;  %397 = vmatpush.msrb.mxu2 %v337_v13  ;;  %v339_v26 = vsub.f32 %v337_v13, %v338_v20  ;;  %v345_v27 = vsub.f32 %v343_v14, %v344_v21  ;;  %526 = vmatpush.msrb.mxu0 %v338_v20  ;;  %v1222_v32 = vsub.f32 %v219_v19, %v1212_v25  ;;  %s962_s22 = scalar_lea.hbm %s961_s21, 64  ;;  %p967_p10 = scmp.lt.s32.totalorder %s961_s21, %s1363_s2 }
  0x2c   : > { %v259_v28 = vand.u32 4294901760, %v1209_v23  ;;  %v299_v30 = vand.u32 4294901760, %v1205_v22  ;;  %v273_v44 = vand.u32 4294901760, %v222_v41  ;;  %v237_v46 = vsel %vm214_vm0, %v211_v39, 0  ;;  %p963_p1 = scmp.ne.s32.totalorder %s961_s21, %s962_s22  ;;  %p968_p12 = scmp.lt.s32.totalorder %s966_s18, %s962_s22 }
  0x2d   : > { %v292_v29 = vsub.f32 %v1199_v17, %v291_v24  ;;  %400 = vmatpush.msrb.mxu2 %v343_v14  ;;  %v340_v34 = vand.u32 4294901760, %v339_v26  ;;  %v346_v35 = vand.u32 4294901760, %v345_v27  ;;  %530 = vmatpush.msrb.mxu0 %v344_v21  ;;  %v267_v38 = vand.u32 4294901760, %v1222_v32 }
  0x2e   : > { %v260_v36 = vsub.f32 %v1209_v23, %v259_v28  ;;  %v300_v42 = vsub.f32 %v1205_v22, %v299_v30  ;;  %v274_v48 = vsub.f32 %v222_v41, %v273_v44  ;;  %v225_v49 = vsel %vm214_vm0, %v207_v45, 0  ;;  %p964_p4 = pnand %p963_p1, %p1137_p5  ;;  %p969_p13 = por %p968_p12, %p967_p10 }
  0x2f   : > { %v293_v37 = vand.u32 4294901760, %v292_v29  ;;  %806 = vmatpush.msra.mxu3 %v340_v34  ;;  %341 = vmatpush.msra.mxu1 %v340_v34  ;;  %v268_v47 = vsub.f32 %v1222_v32, %v267_v38  ;;  %v307_v51 = vand.u32 4294901760, %v1235_v43  ;;  %v313_v52 = vand.u32 4294901760, %v237_v46 }
  0x30   : > { %v261_v40 = vand.u32 4294901760, %v260_v36  ;;  %v301_v50 = vand.u32 4294901760, %v300_v42  ;;  %v275_v54 = vand.u32 4294901760, %v274_v48  ;;  %v281_v55 = vand.u32 4294901760, %v225_v49  ;;  %p965_p8 = pneg %p964_p4 }
  0x31   : > { %294 = vmatmul.f32.vlgmr.msra.gmra.mxu2 %v293_v37  ;;  %807 = vmatpush.msra.mxu3 %v346_v35  ;;  %v269_v53 = vand.u32 4294901760, %v268_v47  ;;  %v308_v56 = vsub.f32 %v1235_v43, %v307_v51  ;;  %v314_v57 = vsub.f32 %v237_v46, %v313_v52  ;;  %vm656_vm2 = vcmask 523264  }
  0x32   : > { %347 = vmatpush.msra.mxu1 %v346_v35  ;;  %365 = vmatmul.f32.vlgmr.msra.gmra.mxu3 %v1185_v9  ;;  %v276_v58 = vsub.f32 %v274_v48, %v275_v54  ;;  %v282_v59 = vsub.f32 %v225_v49, %v281_v55  ;;  %p970_p0 = pnand %p969_p13, %p965_p8 }
  0x33   : > { %262 = vmatmul.f32.vlgmr.msra.gmra.mxu0 %v261_v40  ;;  %457 = vmatpush.msrb.mxu3 %v1177_v3  ;;  %v309_v60 = vand.u32 4294901760, %v308_v56  ;;  %v315_v61 = vand.u32 4294901760, %v314_v57 }
  0x34   : > { %349 = vmatmul.f32.vlgmr.msra.gmra.mxu1 %v1196_v16  ;;  %v277_v62 = vand.u32 4294901760, %v276_v58  ;;  %v283_v63 = vand.u32 4294901760, %v282_v59 }
  0x35   : > { %579 = vmatpush.msrb.mxu1 %v1177_v3  ;;  %459 = vmatpush.msrb.mxu3 %v1179_v4  ;;  %v316_v0 = vsub.f32 %v314_v57, %v315_v61 }
  0x36   : > { %v284_v1 = vsub.f32 %v282_v59, %v283_v63 }
  0x37   : > { %581 = vmatpush.msrb.mxu1 %v1179_v4  ;;  %v317_v2 = vand.u32 4294901760, %v316_v0 }
  0x38   : > { %v285_v3 = vand.u32 4294901760, %v284_v1 }
  0x39   : > { %302 = vmatmul.f32.gmra.mxu2 %v301_v50 }
  0x3a   : > { %369 = vmatmul.f32.gmra.mxu3 %v1194_v15 }
  0x3b   : > { %270 = vmatmul.f32.gmra.mxu0 %v269_v53 }
  0x3c   : > { %353 = vmatmul.f32.gmra.mxu1 %v1212_v25 }
  0x41   : > { %310 = vmatmul.f32.gmra.mxu2 %v309_v60 }
  0x42   : > { %373 = vmatmul.f32.gmra.mxu3 %v1219_v31 }
  0x43   : > { %278 = vmatmul.f32.gmra.mxu0 %v277_v62 }
  0x44   : > { %357 = vmatmul.f32.gmra.mxu1 %v273_v44 }
  0x49   : > { %318 = vmatmul.f32.gmra.mxu2 %v317_v2 }
  0x4a   : > { %377 = vmatmul.f32.gmra.mxu3 %v313_v52 }
  0x4b   : > { %286 = vmatmul.f32.gmra.mxu0 %v285_v3 }
  0x4c   : > { %361 = vmatmul.f32.gmra.mxu1 %v281_v55 }
  0x51   : > { %403 = vmatmul.f32.vlgmr.msrb.gmra.mxu2 %v1209_v23 }
  0x52   : > { %463 = vmatmul.f32.vlgmr.msrb.gmra.mxu3 %v259_v28 }
  0x53   : > { %532 = vmatmul.f32.vlgmr.msrb.gmra.mxu0 %v1196_v16 }
  0x54   : > { %583 = vmatmul.f32.vlgmr.msrb.gmra.mxu1 %v1196_v16 }
  0x59   : > { %408 = vmatmul.f32.gmra.mxu2 %v1222_v32 }
  0x5a   : > { %469 = vmatmul.f32.gmra.mxu3 %v267_v38 }
  0x5b   : > { %536 = vmatmul.f32.gmra.mxu0 %v1212_v25 }
  0x5c   : > { %587 = vmatmul.f32.gmra.mxu1 %v1212_v25 }
  0x61   : > { %413 = vmatmul.f32.gmra.mxu2 %v274_v48 }
  0x62   : > { %475 = vmatmul.f32.gmra.mxu3 %v275_v54 }
  0x63   : > { %540 = vmatmul.f32.gmra.mxu0 %v273_v44 }
  0x64   : > { %591 = vmatmul.f32.gmra.mxu1 %v273_v44 }
  0x69   : > { %418 = vmatmul.f32.gmra.mxu2 %v282_v59 }
  0x6a   : > { %481 = vmatmul.f32.gmra.mxu3 %v283_v63 }
  0x6b   : > { %544 = vmatmul.f32.gmra.mxu0 %v281_v55 }
  0x6c   : > { %595 = vmatmul.f32.gmra.mxu1 %v281_v55 }
  0x71   : > { %423 = vmatmul.f32.gmra.mxu2 %v1199_v17 }
  0x72   : > { %487 = vmatmul.f32.gmra.mxu3 %v291_v24 }
  0x73   : > { %548 = vmatmul.f32.gmra.mxu0 %v1185_v9 }
  0x74   : > { %599 = vmatmul.f32.gmra.mxu1 %v1185_v9 }
  0x79   : > { %428 = vmatmul.f32.gmra.mxu2 %v1205_v22 }
  0x7a   : > { %493 = vmatmul.f32.gmra.mxu3 %v299_v30 }
  0x7b   : > { %552 = vmatmul.f32.gmra.mxu0 %v1194_v15 }
  0x7c   : > { %603 = vmatmul.f32.gmra.mxu1 %v1194_v15 }
  0x81   : > { %433 = vmatmul.f32.gmra.mxu2 %v1235_v43 }
  0x82   : > { %499 = vmatmul.f32.gmra.mxu3 %v307_v51 }
  0x83   : > { %556 = vmatmul.f32.gmra.mxu0 %v1219_v31 }
  0x84   : > { %607 = vmatmul.f32.gmra.mxu1 %v1219_v31 }
  0x89   : > { %438 = vmatmul.f32.gmra.mxu2 %v314_v57 }
  0x8a   : > { %505 = vmatmul.f32.gmra.mxu3 %v315_v61 }
  0x8b   : > { %560 = vmatmul.f32.gmra.mxu0 %v313_v52 }
  0x8c   : > { %611 = vmatmul.f32.gmra.mxu1 %v313_v52 }
  0xb0   : > { %v263_v4 = vpop.f32.mrf.mxu0 }
  0xb1   : > { %v350_v5 = vpop.f32.mrf.mxu1 }
  0xb2   : > { %v351_v22 = vadd.f32 %v350_v5, %v263_v4 }
  0xb4   : > { %v295_v6 = vpop.f32.mrf.mxu2 }
  0xb5   : > { %v366_v7 = vpop.f32.mrf.mxu3 }
  0xb6   : > { %v367_v57 = vadd.f32 %v366_v7, %v295_v6 }
  0xb8   : > { %v271_v8 = vpop.f32.mrf.mxu0 }
  0xb9   : > { %v354_v9 = vpop.f32.mrf.mxu1 }
  0xba   : > { %v355_v30 = vadd.f32 %v354_v9, %v271_v8 }
  0xbc   : > { %v303_v10 = vpop.f32.mrf.mxu2 }
  0xbd   : > { %v370_v11 = vpop.f32.mrf.mxu3 }
  0xbe   : > { %v371_v1 = vadd.f32 %v370_v11, %v303_v10 }
  0xc0   : > { %v279_v12 = vpop.f32.mrf.mxu0 }
  0xc1   : > { %v358_v13 = vpop.f32.mrf.mxu1 }
  0xc2   : > { %v359_v39 = vadd.f32 %v358_v13, %v279_v12 }
  0xc4   : > { %v1273_v14 = vpop.f32.mrf.mxu2 }
  0xc5   : > { %v1275_v15 = vpop.f32.mrf.mxu3 }
  0xc6   : > { %v375_v6 = vadd.f32 %v1275_v15, %v1273_v14 }
  0xc8   : > { %v287_v16 = vpop.f32.mrf.mxu0 }
  0xc9   : > { %v362_v17 = vpop.f32.mrf.mxu1 }
  0xca   : > { %v363_v48 = vadd.f32 %v362_v17, %v287_v16 }
  0xcc   : > { %v1277_v18 = vpop.f32.mrf.mxu2 }
  0xcd   : > { %v1279_v19 = vpop.f32.mrf.mxu3 }
  0xd0   : > { %v533_v20 = vpop.f32.mrf.mxu0 }
  0xd1   : > { %v584_v21 = vpop.f32.mrf.mxu1 }
  0xd4   : > { %v404_v23 = vpop.f32.mrf.mxu2 }
  0xd5   : > { %v405_v24 = vadd.f32 %v404_v23, %v351_v22  ;;  %v464_v25 = vpop.f32.mrf.mxu3  ;;  %v379_v22 = vadd.f32 %v1279_v19, %v1277_v18 }
  0xd7   : > { %v465_v26 = vadd.f32 %v464_v25, %v405_v24 }
  0xd8   : > { %v537_v27 = vpop.f32.mrf.mxu0 }
  0xd9   : > { %v534_v28 = vadd.f32 %v533_v20, %v465_v26  ;;  %v588_v29 = vpop.f32.mrf.mxu1 }
  0xdb   : > { %v1281_v31 = vadd.f32 %v584_v21, %v534_v28 }
  0xdc   : > { %v409_v32 = vpop.f32.mrf.mxu2 }
  0xdd   : > { %v410_v33 = vadd.f32 %v409_v32, %v355_v30  ;;  %623 = vrot.lane.b32.xlu0 %v1281_v31, %s1037_s17  ;;  %v470_v34 = vpop.f32.mrf.mxu3 }
  0xdf   : > { %v471_v35 = vadd.f32 %v470_v34, %v410_v33 }
  0xe0   : > { %v541_v36 = vpop.f32.mrf.mxu0 }
  0xe1   : > { %v538_v37 = vadd.f32 %v537_v27, %v471_v35  ;;  %v592_v38 = vpop.f32.mrf.mxu1 }
  0xe3   : > { %v1285_v40 = vadd.f32 %v588_v29, %v538_v37 }
  0xe4   : > { %v414_v41 = vpop.f32.mrf.mxu2 }
  0xe5   : > { %v415_v42 = vadd.f32 %v414_v41, %v359_v39  ;;  %625 = vrot.lane.b32.xlu0 %v1285_v40, %s1037_s17  ;;  %v476_v43 = vpop.f32.mrf.mxu3 }
  0xe7   : > { %v477_v44 = vadd.f32 %v476_v43, %v415_v42 }
  0xe8   : > { %v545_v45 = vpop.f32.mrf.mxu0 }
  0xe9   : > { %v542_v46 = vadd.f32 %v541_v36, %v477_v44  ;;  %v596_v47 = vpop.f32.mrf.mxu1 }
  0xeb   : > { %v1289_v49 = vadd.f32 %v592_v38, %v542_v46 }
  0xec   : > { %v419_v50 = vpop.f32.mrf.mxu2 }
  0xed   : > { %v420_v51 = vadd.f32 %v419_v50, %v363_v48  ;;  %627 = vrot.lane.b32.xlu1 %v1289_v49, %s1037_s17  ;;  %v482_v52 = vpop.f32.mrf.mxu3 }
  0xef   : > { %v483_v53 = vadd.f32 %v482_v52, %v420_v51 }
  0xf0   : > { %v549_v54 = vpop.f32.mrf.mxu0 }
  0xf1   : > { %v546_v55 = vadd.f32 %v545_v45, %v483_v53  ;;  %v600_v56 = vpop.f32.mrf.mxu1 }
  0xf3   : > { %v597_v58 = vadd.f32 %v596_v47, %v546_v55 }
  0xf4   : > { %v424_v59 = vpop.f32.mrf.mxu2 }
  0xf5   : > { %v425_v60 = vadd.f32 %v424_v59, %v367_v57  ;;  %629 = vrot.lane.b32.xlu1 %v597_v58, %s1037_s17  ;;  %v488_v61 = vpop.f32.mrf.mxu3 }
  0xf7   : > { %v489_v62 = vadd.f32 %v488_v61, %v425_v60 }
  0xf8   : > { %v553_v0 = vpop.f32.mrf.mxu0 }
  0xf9   : > { %v550_v63 = vadd.f32 %v549_v54, %v489_v62  ;;  %v604_v4 = vpop.f32.mrf.mxu1 }
  0xfb   : > { %v601_v2 = vadd.f32 %v600_v56, %v550_v63 }
  0xfc   : > { %v429_v3 = vpop.f32.mrf.mxu2 }
  0xfd   : > { %v430_v5 = vadd.f32 %v429_v3, %v371_v1  ;;  %631 = vrot.lane.b32.xlu2 %v601_v2, %s1037_s17  ;;  %v494_v8 = vpop.f32.mrf.mxu3 }
  0xff   : > { %v495_v9 = vadd.f32 %v494_v8, %v430_v5 }
 0x100   : > { %v557_v16 = vpop.f32.mrf.mxu0 }
 0x101   : > { %v554_v12 = vadd.f32 %v553_v0, %v495_v9  ;;  %v608_v10 = vpop.f32.mrf.mxu1 }
 0x103   : > { %v605_v7 = vadd.f32 %v604_v4, %v554_v12 }
 0x104   : > { %v434_v13 = vpop.f32.mrf.mxu2 }
 0x105   : > { %v435_v17 = vadd.f32 %v434_v13, %v375_v6  ;;  %633 = vrot.lane.b32.xlu2 %v605_v7, %s1037_s17  ;;  %v500_v20 = vpop.f32.mrf.mxu3 }
 0x107   : > { %v501_v11 = vadd.f32 %v500_v20, %v435_v17 }
 0x108   : > { %v561_v15 = vpop.f32.mrf.mxu0 }
 0x109   : > { %v558_v21 = vadd.f32 %v557_v16, %v501_v11  ;;  %v612_v27 = vpop.f32.mrf.mxu1 }
 0x10b   : > { %v609_v23 = vadd.f32 %v608_v10, %v558_v21 }
 0x10c   : > { %v439_v24 = vpop.f32.mrf.mxu2 }
 0x10d   : > { %v440_v25 = vadd.f32 %v439_v24, %v379_v22  ;;  %635 = vrot.lane.b32.xlu0 %v609_v23, %s1037_s17  ;;  %v506_v14 = vpop.f32.mrf.mxu3 }
 0x10f   : > { %v507_v26 = vadd.f32 %v506_v14, %v440_v25 }
 0x111   : > { %v562_v28 = vadd.f32 %v561_v15, %v507_v26 }
 0x113   : > { %v613_v29 = vadd.f32 %v612_v27, %v562_v28 }
 0x115   : > { %637 = vrot.lane.b32.xlu1 %v613_v29, %s1037_s17 }
 0x14f   : > { %v624_v30 = vpop.permute.xlu0 %623 }
 0x150   : > { %v648_v18 = vsel %vm647_vm1, %v1281_v31, %v624_v30 }
 0x151   : > { %657 = vst.msk [vmem:[%s199_s19] sm:$0xff] %vm656_vm2, %v648_v18 }
 0x157   : > { %v632_v19 = vpop.permute.xlu2 %631  ;;  %v626_v32 = vpop.permute.xlu0 %625 }
 0x158   : > { %v652_v33 = vsel %vm647_vm1, %v601_v2, %v632_v19  ;;  %v649_v34 = vsel %vm647_vm1, %v1285_v40, %v626_v32 }
 0x159   : > { %661 = vst.msk [vmem:[%s199_s19 + $0x20] sm:$0xff] %vm656_vm2, %v652_v33 }
 0x15a   : > { %658 = vst.msk [vmem:[%s199_s19 + $0x8] sm:$0xff] %vm656_vm2, %v649_v34 }
 0x15f   : > { %v634_v35 = vpop.permute.xlu2 %633  ;;  %v628_v36 = vpop.permute.xlu1 %627 }
 0x160   : > { %v653_v31 = vsel %vm647_vm1, %v605_v7, %v634_v35  ;;  %v650_v37 = vsel %vm647_vm1, %v1289_v49, %v628_v36 }
 0x161   : > { %662 = vst.msk [vmem:[%s199_s19 + $0x28] sm:$0xff] %vm656_vm2, %v653_v31 }
 0x162   : > { %659 = vst.msk [vmem:[%s199_s19 + $0x10] sm:$0xff] %vm656_vm2, %v650_v37 }
 0x167   : > { %v630_v38 = vpop.permute.xlu1 %629 }
 0x168   : > { %v651_v39 = vsel %vm647_vm1, %v597_v58, %v630_v38 }
 0x169   : > { %660 = vst.msk [vmem:[%s199_s19 + $0x18] sm:$0xff] %vm656_vm2, %v651_v39 }
 0x17f   : > { %v636_v40 = vpop.permute.xlu0 %635 }
 0x180   : > { %v654_v41 = vsel %vm647_vm1, %v609_v23, %v636_v40 }
 0x181   : > { %663 = vst.msk [vmem:[%s199_s19 + $0x30] sm:$0xff] %vm656_vm2, %v654_v41 }
 0x187   : > { %v638_v42 = vpop.permute.xlu1 %637 }
 0x188   : > { %v655_v43 = vsel %vm647_vm1, %v613_v29, %v638_v42 }
 0x189   : > { %664 = vst.msk [vmem:[%s199_s19 + $0x38] sm:$0xff] %vm656_vm2, %v655_v43 }
 0x18a   : > { %973 = shalt.err (!%p970_p0)
}
 0x18b   : > { %s1038_s30 = smov 128   ;;  %s1039_s7 = smov 8  }
 0x18c   : > { %814 = dma.vmem_to_hbm [thread:$0]  (%p1137_p5), %s682_s15, 1024, %s684_s16, %s666_s12, %s1038_s30, %s1038_s30, %s1039_s7  }
 0x18d PF: > { %s698_s3 = sand.u32 1, %s1012_s9   ;;  %p825_p3 = pnand %p785_p11, %p1104_p6 }
 0x18e   : > { %s699_s17 = scalar_lea.sflag [#allocation4], %s698_s3 }
 0x18f   : > { %p826_p7 = pneg %p825_p3 }
 0x191   : > { %1007 = dma.done.wait (%p826_p7), %s699_s17, 1024  }
 0x192   : > { %1009 = vsyncadd (%p826_p7), %s699_s17, 4294966272  ;;  %s19_s14 = sadd.s32 1, %s1032_s14   ;;  %s1371_s9 = smov %s1016_s10 }
 0x193   : > { %p16_p9 = scmp.ge.s32.totalorder %s19_s14, 4   ;;  %s1372_s10 = smov %s1020_s11 }
 0x194   : > { %s1373_s11 = smov %s1146_s8  ;;  %s1374_s12 = smov %s1028_s13 }
 0x195   : > { %s1375_s13 = smov %s1377_s29  ;;  %18 = sbr.rel (!%p16_p9) target bundleno = 7 (0x7), region = 77 }
 0x19a   :  { %705 = vsyncpa [#allocation3], 1 }
 0x19b   :  { %707 = vsyncpa [#allocation3 + $0x1], 1 }
 0x19c   :  { %708 = vsyncpa [#allocation6], 1 }
 0x19d   :  { %709 = vsyncpa [#allocation4], 1 }
 0x19e   :  { %711 = vsyncpa [#allocation4 + $0x1], 1 }

</bundles_post_ra>
